<compile_context>
chip_gen: v7x
topology: tpu7x:2x2x1
jax: 0.10.0
libtpu: 0.0.40
codegen_flags: <defaults>
</compile_context>

<pallas_src>
import functools

import jax
import jax.numpy as jnp
from jax.experimental import pallas as pl
from jax.experimental.pallas import tpu as pltpu

_NEG_BIG = -1e30  # bias on padded logit lanes -> exp() underflows to exactly 0


# ----------------------------------------------------------------------------
# small planning helpers (trace-time Python)
# ----------------------------------------------------------------------------
def _round_up(a, b):
    return ((a + b - 1) // b) * b


def _vmem_capacity_bytes():
    try:
        return int(pltpu.get_tpu_info().vmem_capacity_bytes)
    except Exception:
        return 64 * 1024 * 1024  # conservative (v7x per-TC physical VMEM)


def _choose_batch_tile(batch, tm_cap):
    """Batch tile that (a) is a multiple of 16 (packed-sublane friendly),
    (b) keeps >=2 grid steps when batch >= 32 so the 'parallel' axis can shard
    across both v7x TensorCores, and (c) minimizes padded rows."""
    if batch < 32:
        return batch, batch                      # one full-extent tile, no pad
    cap = max(16, min(int(tm_cap), _round_up(batch, 16) // 2))
    cap = (cap // 16) * 16
    best = None
    for tm in range(16, cap + 1, 16):
        b_pad = _round_up(batch, tm)
        key = (b_pad - batch, -tm)               # least padding, then biggest tile
        if best is None or key < best[0]:
            best = (key, tm, b_pad)
    return best[1], best[2]


def _choose_k_tile(depth, tk_target=512):
    """K tile (multiple of 128) minimizing padding of the reduction dim."""
    d128 = _round_up(depth, 128)
    cap = min(_round_up(tk_target, 128), d128)
    best = None
    for tk in range(128, cap + 1, 128):
        d_pad = _round_up(depth, tk)
        key = (d_pad - depth, -tk)
        if best is None or key < best[0]:
            best = (key, tk, d_pad)
    return best[1], best[2]


# ----------------------------------------------------------------------------
# kernels
# ----------------------------------------------------------------------------
def _softmax_mix_epilogue(logits, n_half):
    """0.5*softmax(lf) and 0.5*softmax(hf) over a concatenated logit block.

    logits: (tm, 2*n_half) f32.  lf logits live in lanes [0, n_half), hf
    logits in [n_half, 2*n_half); padded lanes carry a -1e30 bias so they
    contribute exactly 0 after exp.
    """
    lane = jax.lax.broadcasted_iota(jnp.int32, logits.shape, 1)
    is_lf = lane < n_half
    m_lf = jnp.max(jnp.where(is_lf, logits, _NEG_BIG), axis=-1, keepdims=True)
    m_hf = jnp.max(jnp.where(is_lf, _NEG_BIG, logits), axis=-1, keepdims=True)
    # One exp over the whole block keeps the EUP FIFO fed.
    e = jnp.exp(logits - jnp.where(is_lf, m_lf, m_hf))
    s_lf = jnp.sum(jnp.where(is_lf, e, 0.0), axis=-1, keepdims=True)
    s_hf = jnp.sum(jnp.where(is_lf, 0.0, e), axis=-1, keepdims=True)
    # Exact reciprocal: rows of the mixture sum to 1 at f32 precision; this
    # runs once per batch tile so the cost is negligible.
    inv = jnp.where(is_lf,
                    pl.reciprocal(s_lf, approx=False),
                    pl.reciprocal(s_hf, approx=False))
    return e * (0.5 * inv)


def _lfhf_kernel_resident(x_ref, w_ref, b_ref, out_ref, *, n_half):
    """Resident-W path: x_ref (tm, D) caller dtype, w_ref (D, 2*n_half) bf16,
    b_ref (1, 2*n_half) f32, out_ref (tm, 2*n_half) f32."""
    x = x_ref[...].astype(w_ref.dtype)                 # in-kernel cast (VPU)
    logits = jnp.dot(x, w_ref[...],
                     preferred_element_type=jnp.float32) + b_ref[...]
    out_ref[...] = _softmax_mix_epilogue(logits, n_half).astype(out_ref.dtype)


def _lfhf_kernel_ktiled(x_ref, w_ref, b_ref, out_ref, acc_ref, *, n_half):
    """Fallback for very large D: K-tiled with a resident f32 accumulator."""
    k = pl.program_id(1)

    @pl.when(k == 0)
    def _():
        acc_ref[...] = jnp.zeros_like(acc_ref)

    acc_ref[...] += jnp.dot(x_ref[...].astype(w_ref.dtype), w_ref[...],
                            preferred_element_type=jnp.float32)

    @pl.when(k == pl.num_programs(1) - 1)
    def _():
        logits = acc_ref[...] + b_ref[...]
        out_ref[...] = _softmax_mix_epilogue(logits, n_half).astype(out_ref.dtype)


# ----------------------------------------------------------------------------
# one-time weight packing (model init) + forward
# ----------------------------------------------------------------------------
def pack_lfhf_params(w_lf, b_lf, w_hf, b_hf, *, compute_dtype=jnp.bfloat16):
    """Pack both heads once at model-init time (NOT per forward call)."""
    D, N = w_lf.shape
    assert w_hf.shape == (D, N)

    # Class layout: compact single 128-lane block when both heads fit.
    n_half = 64 if N <= 64 else _round_up(N, 128)
    two_n = 2 * n_half
    w_itemsize = jnp.dtype(compute_dtype).itemsize

    vmem_cap = _vmem_capacity_bytes()
    # ~48 MiB on v7x (64 MiB physical), up to ~96 MiB on v5e/v6e (128 MiB).
    vmem_limit = int(min(0.75 * vmem_cap, 100 * 1024 * 1024))
    budget = int(0.6 * vmem_limit)                       # compiler headroom

    # Resident-W plan: whole (D, two_n) weight stays in VMEM (no K tiling).
    w_resident_bytes = 2 * D * two_n * w_itemsize        # conservative 2x buffer
    min_tile_bytes = 2 * 16 * (D * 4 + two_n * 4)        # smallest x/out tiles
    resident = (w_resident_bytes + min_tile_bytes) <= budget
    if resident:
        tk, d_pad = D, D
    else:
        tk, d_pad = _choose_k_tile(D, 512)

    w_cat = jnp.zeros((d_pad, two_n), compute_dtype)
    w_cat = w_cat.at[:D, :N].set(w_lf.astype(compute_dtype))
    w_cat = w_cat.at[:D, n_half:n_half + N].set(w_hf.astype(compute_dtype))

    b_cat = jnp.full((1, two_n), _NEG_BIG, jnp.float32)
    b_cat = b_cat.at[:, :N].set(b_lf.reshape(1, N).astype(jnp.float32))
    b_cat = b_cat.at[:, n_half:n_half + N].set(b_hf.reshape(1, N).astype(jnp.float32))

    meta = dict(D=D, N=N, n_half=n_half, two_n=two_n, d_pad=d_pad, tk=tk,
                resident=resident, budget=budget, vmem_limit=vmem_limit,
                w_itemsize=w_itemsize)
    return dict(w_cat=w_cat, b_cat=b_cat, meta=meta)


def lfhf_forward(x, packed, *, tm_max=1024):
    """x: (B, C, H, W), any float dtype.  Returns (B, N) f32 probabilities."""
    w_cat, b_cat, meta = packed["w_cat"], packed["b_cat"], packed["meta"]
    D, N = meta["D"], meta["N"]
    n_half, two_n = meta["n_half"], meta["two_n"]
    d_pad, tk = meta["d_pad"], meta["tk"]
    budget = meta["budget"]

    B = x.shape[0]
    x_flat = x.reshape(B, -1)                  # caller dtype; no wrapper cast
    assert x_flat.shape[1] == D
    x_itemsize = x_flat.dtype.itemsize

    if meta["resident"]:
        # -------- resident-W path: W in VMEM across all batch tiles --------
        w_resident_bytes = 2 * d_pad * two_n * meta["w_itemsize"]
        per_row = 2 * (D * x_itemsize + two_n * 4)        # dbl-buffered x + out
        tm_cap = max(16, (budget - w_resident_bytes) // max(per_row, 1))
        tm, b_pad = _choose_batch_tile(B, min(tm_max, tm_cap))

        x_in = x_flat
        if b_pad != B:                 # rare tail padding (< tm rows), not a
            x_in = jnp.pad(x_flat, ((0, b_pad - B), (0, 0)))   # full round-trip

        grid = (b_pad // tm,)
        cost = pl.CostEstimate(
            flops=2 * b_pad * D * two_n,
            transcendentals=b_pad * two_n,
            bytes_accessed=(b_pad * D * x_itemsize
                            + d_pad * two_n * meta["w_itemsize"]   # W once
                            + b_cat.size * 4 + b_pad * two_n * 4),
        )
        probs = pl.pallas_call(
            functools.partial(_lfhf_kernel_resident, n_half=n_half),
            out_shape=jax.ShapeDtypeStruct((b_pad, two_n), jnp.float32),
            grid_spec=pltpu.PrefetchScalarGridSpec(
                num_scalar_prefetch=0,
                grid=grid,
                in_specs=[
                    pl.BlockSpec((tm, D), lambda i: (i, 0)),       # x tile
                    pl.BlockSpec((D, two_n), lambda i: (0, 0)),    # resident W
                    pl.BlockSpec((1, two_n), lambda i: (0, 0)),    # biases
                ],
                out_specs=pl.BlockSpec((tm, two_n), lambda i: (i, 0)),
            ),
            compiler_params=pltpu.CompilerParams(
                dimension_semantics=("parallel",),
                vmem_limit_bytes=meta["vmem_limit"],
            ),
            cost_estimate=cost,
        )(x_in, w_cat, b_cat)
    else:
        # -------- K-tiled fallback (W too large for VMEM residency) --------
        w_tile_bytes = 2 * tk * two_n * meta["w_itemsize"]
        per_row = 2 * (tk * x_itemsize + two_n * 4) + two_n * 4   # x/out + acc
        tm_cap = max(16, (budget - w_tile_bytes) // max(per_row, 1))
        tm, b_pad = _choose_batch_tile(B, min(tm_max, tm_cap))

        x_in = x_flat
        if (b_pad, d_pad) != (B, D):
            x_in = jnp.pad(x_flat, ((0, b_pad - B), (0, d_pad - D)))

        grid = (b_pad // tm, d_pad // tk)
        cost = pl.CostEstimate(
            flops=2 * b_pad * d_pad * two_n,
            transcendentals=b_pad * two_n,
            bytes_accessed=(b_pad * d_pad * x_itemsize
                            + grid[0] * d_pad * two_n * meta["w_itemsize"]
                            + b_cat.size * 4 + b_pad * two_n * 4),
        )
        probs = pl.pallas_call(
            functools.partial(_lfhf_kernel_ktiled, n_half=n_half),
            out_shape=jax.ShapeDtypeStruct((b_pad, two_n), jnp.float32),
            grid_spec=pltpu.PrefetchScalarGridSpec(
                num_scalar_prefetch=0,
                grid=grid,
                in_specs=[
                    pl.BlockSpec((tm, tk), lambda i, k: (i, k)),     # x tile
                    pl.BlockSpec((tk, two_n), lambda i, k: (k, 0)),  # W tile
                    pl.BlockSpec((1, two_n), lambda i, k: (0, 0)),   # biases
                ],
                out_specs=pl.BlockSpec((tm, two_n), lambda i, k: (i, 0)),
                scratch_shapes=[pltpu.VMEM((tm, two_n), jnp.float32)],
            ),
            compiler_params=pltpu.CompilerParams(
                dimension_semantics=("parallel", "arbitrary"),
                vmem_limit_bytes=meta["vmem_limit"],
            ),
            cost_estimate=cost,
        )(x_in, w_cat, b_cat)

    # Combine the two 0.5-weighted per-head probability blocks.  This is a
    # tiny (B, N) op in the wrapper, keeping the kernel's store lane-dense.
    return probs[:B, :N] + probs[:B, n_half:n_half + N]


# ----------------------------------------------------------------------------
# plain-JAX reference (same bf16-input / f32-accumulate matmuls)
# ----------------------------------------------------------------------------
def reference_forward(x, w_lf, b_lf, w_hf, b_hf, compute_dtype=jnp.bfloat16):
    B = x.shape[0]
    xf = x.reshape(B, -1).astype(compute_dtype)
    lf = jnp.dot(xf, w_lf.astype(compute_dtype),
                 preferred_element_type=jnp.float32) + b_lf.reshape(1, -1)
    hf = jnp.dot(xf, w_hf.astype(compute_dtype),
                 preferred_element_type=jnp.float32) + b_hf.reshape(1, -1)
    return 0.5 * jax.nn.softmax(lf, axis=1) + 0.5 * jax.nn.softmax(hf, axis=1)


if __name__ == "__main__":
    # Small NCHW-classifier shapes.
    B, C, H, W = 2, 4, 16, 16
    D = C * H * W          # 1024
    NUM_CLASSES = 16

    key = jax.random.PRNGKey(0)
    kx, k1, k2, k3, k4 = jax.random.split(key, 5)

    x = jax.random.normal(kx, (B, C, H, W), dtype=jnp.float32)
    w_lf = jax.random.normal(k1, (D, NUM_CLASSES), dtype=jnp.float32) * 0.02
    b_lf = jax.random.normal(k2, (1, NUM_CLASSES), dtype=jnp.float32) * 0.01
    w_hf = jax.random.normal(k3, (D, NUM_CLASSES), dtype=jnp.float32) * 0.02
    b_hf = jax.random.normal(k4, (1, NUM_CLASSES), dtype=jnp.float32) * 0.01

    # One-time packing (model init), then the fused forward.
    packed = pack_lfhf_params(w_lf, b_lf, w_hf, b_hf)
    out = lfhf_forward(x, packed)
    out = jax.block_until_ready(out)

    ref = reference_forward(x, w_lf, b_lf, w_hf, b_hf)
    assert out.shape == (B, NUM_CLASSES)
    # bf16 matmuls on both sides -> tight-but-robust tolerance on probabilities.
    assert jnp.allclose(out, ref, atol=2e-3, rtol=2e-3), \
        float(jnp.max(jnp.abs(out - ref)))
    # Rows of a 0.5/0.5 mixture of two softmaxes sum to 1 (exact reciprocal).
    assert jnp.allclose(jnp.sum(out, axis=1), jnp.ones((B,)), atol=1e-3)

    print("KERNEL_OK")
</pallas_src>

<mosaic_0001>
module attributes {stable_mosaic.version = 11 : i64} {
  func.func @_lfhf_kernel_resident(%arg0: i32, %arg1: memref<2x1024xf32, #tpu.memory_space<vmem>>, %arg2: memref<1024x128xbf16, #tpu.memory_space<vmem>>, %arg3: memref<1x128xf32, #tpu.memory_space<vmem>>, %arg4: memref<2x128xf32, #tpu.memory_space<vmem>>) attributes {dimension_semantics = [#tpu.dimension_semantics<parallel>], iteration_bounds = array<i64: 1>, scalar_prefetch = 0 : i64, scratch_operands = 0 : i64, tpu.core_type = #tpu.core_type<tc>, window_params = [{transform_indices = @transform_0, window_bounds = array<i64: 2, 1024>}, {pipeline_mode = #tpu.pipeline_mode<synchronous>, transform_indices = @transform_1, window_bounds = array<i64: 1024, 128>}, {pipeline_mode = #tpu.pipeline_mode<synchronous>, transform_indices = @transform_2, window_bounds = array<i64: 1, 128>}, {transform_indices = @transform_3, window_bounds = array<i64: 2, 128>}]} {
    %c0 = arith.constant 0 : index
    %c0_0 = arith.constant 0 : index
    %0 = vector.load %arg1[%c0, %c0_0] : memref<2x1024xf32, #tpu.memory_space<vmem>>, vector<2x1024xf32>
    %1 = arith.truncf %0 : vector<2x1024xf32> to vector<2x1024xbf16>
    %c0_1 = arith.constant 0 : index
    %c0_2 = arith.constant 0 : index
    %2 = vector.load %arg2[%c0_1, %c0_2] : memref<1024x128xbf16, #tpu.memory_space<vmem>>, vector<1024x128xbf16>
    %cst = arith.constant dense<0.000000e+00> : vector<2x128xf32>
    %3 = tpu.matmul %1, %2, %cst {dimension_numbers = #tpu.dot_dimension_numbers<[1], [0], [0], [1], [0, 0, 1, 1], [], []>} : vector<2x1024xbf16>, vector<1024x128xbf16>, vector<2x128xf32> -> vector<2x128xf32>
    %c0_3 = arith.constant 0 : index
    %c0_4 = arith.constant 0 : index
    %4 = vector.load %arg3[%c0_3, %c0_4] : memref<1x128xf32, #tpu.memory_space<vmem>>, vector<1x128xf32>
    %5 = vector.broadcast %4 : vector<1x128xf32> to vector<2x128xf32>
    %6 = arith.addf %3, %5 : vector<2x128xf32>
    %7 = tpu.iota {dimensions = array<i32: 1>} : vector<2x128xi32>
    %c64_i32 = arith.constant 64 : i32
    %8 = vector.broadcast %c64_i32 : i32 to vector<2x128xi32>
    %9 = arith.cmpi slt, %7, %8 : vector<2x128xi32>
    %cst_5 = arith.constant -1.000000e+30 : f32
    %10 = vector.broadcast %cst_5 : f32 to vector<2x128xf32>
    %11 = arith.select %9, %6, %10 : vector<2x128xi1>, vector<2x128xf32>
    %cst_6 = arith.constant dense<0xFF800000> : vector<2xf32>
    %12 = vector.multi_reduction <maximumf>, %11, %cst_6 [1] : vector<2x128xf32> to vector<2xf32>
    %13 = vector.shape_cast %12 : vector<2xf32> to vector<2x1xf32>
    %cst_7 = arith.constant -1.000000e+30 : f32
    %14 = vector.broadcast %cst_7 : f32 to vector<2x128xf32>
    %15 = arith.select %9, %14, %6 : vector<2x128xi1>, vector<2x128xf32>
    %cst_8 = arith.constant dense<0xFF800000> : vector<2xf32>
    %16 = vector.multi_reduction <maximumf>, %15, %cst_8 [1] : vector<2x128xf32> to vector<2xf32>
    %17 = vector.shape_cast %16 : vector<2xf32> to vector<2x1xf32>
    %18 = vector.shape_cast %13 : vector<2x1xf32> to vector<2x1xf32>
    %19 = vector.broadcast %18 : vector<2x1xf32> to vector<2x128xf32>
    %20 = vector.shape_cast %17 : vector<2x1xf32> to vector<2x1xf32>
    %21 = vector.broadcast %20 : vector<2x1xf32> to vector<2x128xf32>
    %22 = arith.select %9, %19, %21 : vector<2x128xi1>, vector<2x128xf32>
    %23 = arith.subf %6, %22 : vector<2x128xf32>
    %24 = math.exp %23 : vector<2x128xf32>
    %cst_9 = arith.constant 0.000000e+00 : f32
    %25 = vector.broadcast %cst_9 : f32 to vector<2x128xf32>
    %26 = arith.select %9, %24, %25 : vector<2x128xi1>, vector<2x128xf32>
    %cst_10 = arith.constant dense<0.000000e+00> : vector<2xf32>
    %27 = vector.multi_reduction <add>, %26, %cst_10 [1] : vector<2x128xf32> to vector<2xf32>
    %28 = vector.shape_cast %27 : vector<2xf32> to vector<2x1xf32>
    %cst_11 = arith.constant 0.000000e+00 : f32
    %29 = vector.broadcast %cst_11 : f32 to vector<2x128xf32>
    %30 = arith.select %9, %29, %24 : vector<2x128xi1>, vector<2x128xf32>
    %cst_12 = arith.constant dense<0.000000e+00> : vector<2xf32>
    %31 = vector.multi_reduction <add>, %30, %cst_12 [1] : vector<2x128xf32> to vector<2xf32>
    %32 = vector.shape_cast %31 : vector<2xf32> to vector<2x1xf32>
    %33 = tpu.reciprocal %28 : vector<2x1xf32> -> vector<2x1xf32>
    %34 = tpu.reciprocal %32 : vector<2x1xf32> -> vector<2x1xf32>
    %35 = vector.shape_cast %33 : vector<2x1xf32> to vector<2x1xf32>
    %36 = vector.broadcast %35 : vector<2x1xf32> to vector<2x128xf32>
    %37 = vector.shape_cast %34 : vector<2x1xf32> to vector<2x1xf32>
    %38 = vector.broadcast %37 : vector<2x1xf32> to vector<2x128xf32>
    %39 = arith.select %9, %36, %38 : vector<2x128xi1>, vector<2x128xf32>
    %cst_13 = arith.constant 5.000000e-01 : f32
    %40 = vector.broadcast %cst_13 : f32 to vector<2x128xf32>
    %41 = arith.mulf %40, %39 : vector<2x128xf32>
    %42 = arith.mulf %24, %41 : vector<2x128xf32>
    %c0_14 = arith.constant 0 : index
    %c0_15 = arith.constant 0 : index
    %43 = vector.load %arg4[%c0_14, %c0_15] : memref<2x128xf32, #tpu.memory_space<vmem>>, vector<2x128xf32>
    tpu.vector_store %arg4[%c0_14, %c0_15], %42 {strides = array<i32>} : memref<2x128xf32, #tpu.memory_space<vmem>>, vector<2x128xf32>,
    return
  }
  func.func @transform_0(%arg0: i32) -> (i32, i32) {
    %c0_i32 = arith.constant 0 : i32
    %c0_i32_0 = arith.constant 0 : i32
    return %arg0, %c0_i32 : i32, i32
  }
  func.func @transform_1(%arg0: i32) -> (i32, i32) {
    %c0_i32 = arith.constant 0 : i32
    %c0_i32_0 = arith.constant 0 : i32
    %c0_i32_1 = arith.constant 0 : i32
    return %c0_i32, %c0_i32_0 : i32, i32
  }
  func.func @transform_2(%arg0: i32) -> (i32, i32) {
    %c0_i32 = arith.constant 0 : i32
    %c0_i32_0 = arith.constant 0 : i32
    %c0_i32_1 = arith.constant 0 : i32
    return %c0_i32, %c0_i32_0 : i32, i32
  }
  func.func @transform_3(%arg0: i32) -> (i32, i32) {
    %c0_i32 = arith.constant 0 : i32
    %c0_i32_0 = arith.constant 0 : i32
    return %arg0, %c0_i32 : i32, i32
  }
}

</mosaic_0001>

<bundles_post_ra>
// kernel: tpu_custom_call.1
= control target key start
LH: loop header
LB: loop body
LE: loop exit
PB: predicated region body
PF: predicated region fallthrough
CT: control target
= control target key end

     0   :  { %8 = vsyncpa [#allocation3], 0  ;;  %s1214_s0 = inlined_call_operand.hbm [shape: f32[2,1024], index: 0, kind: input, shape index: {}]   ;;  %s1215_s1 = inlined_call_operand.hbm [shape: bf16[1024,128], index: 1, kind: input, shape index: {}]   ;;  %s1216_s2 = inlined_call_operand.vmem [shape: f32[1,128], index: 2, kind: input, shape index: {}]   ;;  %s1217_s3 = inlined_call_operand.hbm [shape: f32[2,128], index: 3, kind: output, shape index: {}]  }
   0x1   :  { %9 = vsyncpa [#allocation6], 0 }
   0x2   :  { %10 = vsyncpa [#allocation4], 0  ;;  %s1124_s12 = smov [#allocation2]   ;;  %s1125_s14 = smov [#allocation5]  }
   0x3   :  { %s17_s13 = sshll.u32 %s1124_s12, 4  ;;  %s26_s15 = sshll.u32 %s1125_s14, 4  ;;  %s18_s13 = int_to_ptr.vmem [resolvable:$true] %s17_s13  ;;  %s1150_s15 = int_to_ptr.vmem [resolvable:$true] %s26_s15 }
   0x4   :  { %s1052_s18 = scalar_lea.hbm %s1214_s0, 256 }
   0x5   :  { %p1053_p0 = scmp.ne.s32.totalorder %s1214_s0, %s1052_s18  ;;  %p1056_p1 = scmp.lt.u32.totalorder %s1052_s18, %s1214_s0 }
   0x7   :  { %p1058_p2 = pnand %p1056_p1, %p1053_p0 }
   0x9   :  { %1061 = shalt.err (!%p1058_p2)
}
   0xa   :  { %s1062_s23 = scalar_lea.vmem %s18_s13, 256  ;;  %p1067_p4 = scmp.lt.s32.totalorder %s18_s13, %s18_s13 }
   0xb   :  { %p1063_p3 = scmp.ne.s32.totalorder %s18_s13, %s1062_s23  ;;  %p1068_p5 = scmp.lt.s32.totalorder %s1062_s23, %s1062_s23 }
   0xd   :  { %p1069_p6 = por %p1068_p5, %p1067_p4 }
   0xf   :  { %p1070_p7 = pnand %p1069_p6, %p1063_p3 }
  0x11   :  { %1073 = shalt.err (!%p1070_p7)
}
  0x12   :  { %20 = dma.hbm_to_vmem [thread:$0]  %s1214_s0, 256, %s18_s13, [#allocation3]  }
  0x13   :  { %s1074_s28 = scalar_lea.hbm %s1215_s1, 8192 }
  0x14   :  { %p1075_p8 = scmp.ne.s32.totalorder %s1215_s1, %s1074_s28  ;;  %p1078_p9 = scmp.lt.u32.totalorder %s1074_s28, %s1215_s1 }
  0x16   :  { %p1080_p10 = pnand %p1078_p9, %p1075_p8 }
  0x18   :  { %1083 = shalt.err (!%p1080_p10)
}
  0x19   :  { %s1084_s6 = scalar_lea.vmem %s1150_s15, 8192  ;;  %p1089_p12 = scmp.lt.s32.totalorder %s1150_s15, %s1150_s15 }
  0x1a   :  { %p1085_p11 = scmp.ne.s32.totalorder %s1150_s15, %s1084_s6  ;;  %p1090_p13 = scmp.lt.s32.totalorder %s1084_s6, %s1084_s6 }
  0x1c   :  { %p1091_p0 = por %p1090_p13, %p1089_p12 }
  0x1e   :  { %p1092_p1 = pnand %p1091_p0, %p1085_p11 }
  0x20   :  { %1095 = shalt.err (!%p1092_p1)
}
  0x21   :  { %s1126_s0 = smov 64   ;;  %s1127_s7 = smov 4  }
  0x22   :  { %32 = dma.hbm_to_vmem [thread:$0]  %s1215_s1, 8192, %s1150_s15, [#allocation6], %s1126_s0, %s1126_s0, %s1127_s7  }
  0x23   :  { %1118 = dma.done.wait [#allocation3], 256  }
  0x24   :  { %1119 = vsyncadd [#allocation3], 4294967040 }
  0x25   :  { %1120 = dma.done.wait [#allocation6], 8192  }
  0x26   :  { %1121 = vsyncadd [#allocation6], 4294959104  ;;  %v980_v0 = vld [vmem:[#allocation5 + $0x40] sm:$0xff]   ;;  %v984_v4 = vld [vmem:[#allocation5 + $0x48] sm:$0xff]   ;;  %v1128_v22 = vmov 1983009808   ;;  %v50_v24 = vlaneseq }
  0x27   :  { %v981_v1 = vld [vmem:[#allocation5 + $0xc0] sm:$0xff]   ;;  %886 = vmatprep.subr.bf16.mxu0 %v980_v0  ;;  %v985_v5 = vld [vmem:[#allocation5 + $0xc8] sm:$0xff]   ;;  %v988_v8 = vld [vmem:[#allocation5 + $0x50] sm:$0xff]   ;;  %v48_v23 = vunpack.c.l.s4 %v1128_v22  ;;  %vm779_vm1 = vcmask 1041408  }
  0x28   :  { %v982_v2 = vld [vmem:[#allocation5] sm:$0xff]   ;;  %908 = vmatprep.subr.bf16.mxu1 %v981_v1  ;;  %v986_v6 = vld [vmem:[#allocation5 + $0x8] sm:$0xff]   ;;  %v989_v9 = vld [vmem:[#allocation5 + $0xd0] sm:$0xff]   ;;  %v51_v30 = vshrl.u32 %v50_v24, 7 }
  0x29   :  { %v983_v3 = vld [vmem:[#allocation5 + $0x80] sm:$0xff]   ;;  %887 = vmatpush3.bf16.msra.mxu0 %v982_v2  ;;  %v987_v7 = vld [vmem:[#allocation5 + $0x88] sm:$0xff]   ;;  %v990_v10 = vld [vmem:[#allocation5 + $0x10] sm:$0xff]   ;;  %v49_v29 = vunpack.c.0.s8 %v48_v23 }
  0x2a   :  { %909 = vmatpush3.bf16.msra.mxu1 %v983_v3  ;;  %888 = vmatprep.subr.bf16.mxu0 %v984_v4  ;;  %v991_v11 = vld [vmem:[#allocation5 + $0x90] sm:$0xff]   ;;  %v992_v12 = vld [vmem:[#allocation5 + $0x58] sm:$0xff]   ;;  %v996_v16 = vld [vmem:[#allocation5 + $0x60] sm:$0xff]  }
  0x2b   :  { %910 = vmatprep.subr.bf16.mxu1 %v985_v5  ;;  %v993_v13 = vld [vmem:[#allocation5 + $0xd8] sm:$0xff]   ;;  %v997_v17 = vld [vmem:[#allocation5 + $0xe0] sm:$0xff]   ;;  %v1000_v20 = vld [vmem:[#allocation5 + $0x68] sm:$0xff]   ;;  %v1182_v35 = vsub.s32 %v49_v29, %v51_v30 }
  0x2c   :  { %v994_v14 = vld [vmem:[#allocation5 + $0x18] sm:$0xff]   ;;  %v998_v18 = vld [vmem:[#allocation5 + $0x20] sm:$0xff]   ;;  %v1001_v21 = vld [vmem:[#allocation5 + $0xe8] sm:$0xff]  }
  0x2d   :  { %889 = vmatpush3.bf16.msra.mxu0 %v986_v6  ;;  %v995_v15 = vld [vmem:[#allocation5 + $0x98] sm:$0xff]   ;;  %v999_v19 = vld [vmem:[#allocation5 + $0xa0] sm:$0xff]   ;;  %v1002_v25 = vld [vmem:[#allocation5 + $0x28] sm:$0xff]  }
  0x2e   :  { %911 = vmatpush3.bf16.msra.mxu1 %v987_v7  ;;  %890 = vmatprep.subr.bf16.mxu0 %v988_v8  ;;  %v1003_v26 = vld [vmem:[#allocation5 + $0xa8] sm:$0xff]   ;;  %v1004_v27 = vld [vmem:[#allocation5 + $0x70] sm:$0xff]   ;;  %v1008_v33 = vld [vmem:[#allocation5 + $0x78] sm:$0xff]  }
  0x2f   :  { %912 = vmatprep.subr.bf16.mxu1 %v989_v9  ;;  %v1005_v28 = vld [vmem:[#allocation5 + $0xf0] sm:$0xff]   ;;  %v1009_v34 = vld [vmem:[#allocation5 + $0xf8] sm:$0xff]   ;;  %v1013_v41 = vld [vmem:[#allocation5 + $0x140] sm:$0xff]  }
  0x30   :  { %v1006_v31 = vld [vmem:[#allocation5 + $0x30] sm:$0xff]   ;;  %v1010_v36 = vld [vmem:[#allocation5 + $0x38] sm:$0xff]   ;;  %v1014_v42 = vld [vmem:[#allocation5 + $0x1c0] sm:$0xff]  }
  0x31   :  { %891 = vmatpush3.bf16.msra.mxu0 %v990_v10  ;;  %v1007_v32 = vld [vmem:[#allocation5 + $0xb0] sm:$0xff]   ;;  %v1011_v37 = vld [vmem:[#allocation5 + $0xb8] sm:$0xff]   ;;  %v1015_v48 = vld [vmem:[#allocation5 + $0x100] sm:$0xff]  }
  0x32   :  { %913 = vmatpush3.bf16.msra.mxu1 %v991_v11  ;;  %892 = vmatprep.subr.bf16.mxu0 %v992_v12  ;;  %v42_v38 = vld [vmem:[#allocation2] sm:$0xff]  ;;  %v1017_v50 = vld [vmem:[#allocation5 + $0x148] sm:$0xff]   ;;  %v1016_v52 = vld [vmem:[#allocation5 + $0x180] sm:$0xff]  }
  0x33   :  { %914 = vmatprep.subr.bf16.mxu1 %v993_v13  ;;  %v53_v39 = vrot.slane %v42_v38, %v1182_v35  ;;  %v46_v40 = vcombine.high %v42_v38, %v42_v38  ;;  %v1018_v53 = vld [vmem:[#allocation5 + $0x1c8] sm:$0xff]   ;;  %v1021_v55 = vld [vmem:[#allocation5 + $0x150] sm:$0xff]   ;;  %v1025_v59 = vld [vmem:[#allocation5 + $0x158] sm:$0xff]  }
  0x34   :  { %v1019_v54 = vld [vmem:[#allocation5 + $0x108] sm:$0xff]   ;;  %v1022_v57 = vld [vmem:[#allocation5 + $0x1d0] sm:$0xff]   ;;  %v1026_v61 = vld [vmem:[#allocation5 + $0x1d8] sm:$0xff]  }
  0x35   :  { %893 = vmatpush3.bf16.msra.mxu0 %v994_v14  ;;  %v61_v43 = vcombine.high %v53_v39, %v53_v39  ;;  %v60_v44 = vrot.slane %v46_v40, %v1182_v35  ;;  %v88_v45 = vpack.c.bf16 %v53_v39, %v53_v39  ;;  %v1020_v56 = vld [vmem:[#allocation5 + $0x188] sm:$0xff]   ;;  %v1023_v58 = vld [vmem:[#allocation5 + $0x110] sm:$0xff]   ;;  %v1027_v62 = vld [vmem:[#allocation5 + $0x118] sm:$0xff]  }
  0x36   :  { %915 = vmatpush3.bf16.msra.mxu1 %v995_v15  ;;  %894 = vmatprep.subr.bf16.mxu0 %v996_v16  ;;  %v1024_v60 = vld [vmem:[#allocation5 + $0x190] sm:$0xff]   ;;  %v1029_v63 = vld [vmem:[#allocation5 + $0x160] sm:$0xff]   ;;  %v1028_v0 = vld [vmem:[#allocation5 + $0x198] sm:$0xff]  }
  0x37   :  { %916 = vmatprep.subr.bf16.mxu1 %v997_v17  ;;  %v89_v46 = vpack.c.bf16 %v61_v43, %v61_v43  ;;  %v62_v47 = vcombine.high %v60_v44, %v60_v44  ;;  %v90_v49 = vpack.c.bf16 %v60_v44, %v60_v44  ;;  %v1030_v1 = vld [vmem:[#allocation5 + $0x1e0] sm:$0xff]   ;;  %v1033_v3 = vld [vmem:[#allocation5 + $0x168] sm:$0xff]   ;;  %v1037_v7 = vld [vmem:[#allocation5 + $0x170] sm:$0xff]  }
  0x38   :  { %v1031_v2 = vld [vmem:[#allocation5 + $0x120] sm:$0xff]   ;;  %v1034_v5 = vld [vmem:[#allocation5 + $0x1e8] sm:$0xff]   ;;  %v1038_v9 = vld [vmem:[#allocation5 + $0x1f0] sm:$0xff]  }
  0x39   :  { %895 = vmatpush3.bf16.msra.mxu0 %v998_v18  ;;  %647 = vmatprep.mubr.bf16.mxu0 %v89_v46  ;;  %v91_v51 = vpack.c.bf16 %v62_v47, %v62_v47  ;;  %v1032_v4 = vld [vmem:[#allocation5 + $0x1a0] sm:$0xff]   ;;  %v1035_v6 = vld [vmem:[#allocation5 + $0x128] sm:$0xff]   ;;  %v1039_v10 = vld [vmem:[#allocation5 + $0x130] sm:$0xff]  }
  0x3a   :  { %917 = vmatpush3.bf16.msra.mxu1 %v999_v19  ;;  %896 = vmatprep.subr.bf16.mxu0 %v1000_v20  ;;  %v1036_v8 = vld [vmem:[#allocation5 + $0x1a8] sm:$0xff]   ;;  %v1041_v11 = vld [vmem:[#allocation5 + $0x178] sm:$0xff]   ;;  %v1040_v12 = vld [vmem:[#allocation5 + $0x1b0] sm:$0xff]  }
  0x3b   :  { %918 = vmatprep.subr.bf16.mxu1 %v1001_v21  ;;  %687 = vmatprep.mubr.bf16.mxu1 %v91_v51  ;;  %v1042_v13 = vld [vmem:[#allocation5 + $0x1f8] sm:$0xff]  }
  0x3c   :  { %v43_v14 = vld [vmem:[#allocation2 + $0x8] sm:$0xff] }
  0x3d   :  { %897 = vmatpush3.bf16.msra.mxu0 %v1002_v25  ;;  %v1043_v15 = vld [vmem:[#allocation5 + $0x138] sm:$0xff]   ;;  %v70_v16 = vrot.slane %v43_v14, %v1182_v35  ;;  %v63_v17 = vcombine.high %v43_v14, %v43_v14 }
  0x3e   :  { %919 = vmatpush3.bf16.msra.mxu1 %v1003_v26  ;;  %898 = vmatprep.subr.bf16.mxu0 %v1004_v27  ;;  %v1044_v18 = vld [vmem:[#allocation5 + $0x1b8] sm:$0xff]  }
  0x3f   :  { %920 = vmatprep.subr.bf16.mxu1 %v1005_v28  ;;  %v78_v19 = vcombine.high %v70_v16, %v70_v16  ;;  %v77_v20 = vrot.slane %v63_v17, %v1182_v35  ;;  %v92_v21 = vpack.c.bf16 %v70_v16, %v70_v16  ;;  %v821_v28 = vld [vmem:[%s1216_s2] ss:$0 sm:$0xff]  ;;  %s1129_s2 = smov [#allocation7]  }
  0x40   :  { %s811_s11 = sshll.u32 %s1129_s2, 4  ;;  %s812_s11 = int_to_ptr.vmem [resolvable:$true] %s811_s11 }
  0x41   :  { %899 = vmatpush3.bf16.msra.mxu0 %v1006_v31  ;;  %v93_v22 = vpack.c.bf16 %v78_v19, %v78_v19  ;;  %v79_v23 = vcombine.high %v77_v20, %v77_v20  ;;  %v94_v25 = vpack.c.bf16 %v77_v20, %v77_v20  ;;  %s1096_s12 = scalar_lea.vmem %s812_s11, 32  ;;  %p1101_p3 = scmp.lt.s32.totalorder %s812_s11, %s812_s11 }
  0x42   :  { %921 = vmatpush3.bf16.msra.mxu1 %v1007_v32  ;;  %900 = vmatprep.subr.bf16.mxu0 %v1008_v33  ;;  %p1097_p2 = scmp.ne.s32.totalorder %s812_s11, %s1096_s12  ;;  %p1102_p4 = scmp.lt.s32.totalorder %s1096_s12, %s1096_s12 }
  0x43   :  { %922 = vmatprep.subr.bf16.mxu1 %v1009_v34  ;;  %v95_v26 = vpack.c.bf16 %v79_v23, %v79_v23 }
  0x44   :  { %p1103_p5 = por %p1102_p4, %p1101_p3 }
  0x45   :  { %901 = vmatpush3.bf16.msra.mxu0 %v1010_v36 }
  0x46   :  { %923 = vmatpush3.bf16.msra.mxu1 %v1011_v37  ;;  %930 = vmatprep.subr.bf16.mxu0 %v1013_v41  ;;  %p1104_p6 = pnand %p1103_p5, %p1097_p2 }
  0x47   :  { %952 = vmatprep.subr.bf16.mxu1 %v1014_v42  ;;  %v776_v42 = vand.u32 127, %v50_v24 }
  0x48   :  { %648 = vmatmul.mubr.bf16.vlgmr.msra.gmra.mrb[0].mxu0 %v88_v45 }
  0x49   :  { %931 = vmatpush3.bf16.msra.mxu0 %v1015_v48  ;;  %688 = vmatmul.mubr.bf16.vlgmr.msra.gmra.mrb[0].mxu1 %v90_v49  ;;  %vm777_vm0 = vcmp.lt.s32.totalorder %v776_v42, 64 }
  0x4a   :  { %932 = vmatprep.subr.bf16.mxu0 %v1017_v50  ;;  %953 = vmatpush3.bf16.msra.mxu1 %v1016_v52 }
  0x4b   :  { %954 = vmatprep.subr.bf16.mxu1 %v1018_v53  ;;  %727 = vmatprep.mubr.bf16.mxu0 %v93_v22 }
  0x4c   :  { %767 = vmatprep.mubr.bf16.mxu1 %v95_v26 }
  0x4d   :  { %933 = vmatpush3.bf16.msra.mxu0 %v1019_v54 }
  0x4e   :  { %934 = vmatprep.subr.bf16.mxu0 %v1021_v55  ;;  %955 = vmatpush3.bf16.msra.mxu1 %v1020_v56 }
  0x4f   :  { %956 = vmatprep.subr.bf16.mxu1 %v1022_v57 }
  0x51   :  { %935 = vmatpush3.bf16.msra.mxu0 %v1023_v58 }
  0x52   :  { %936 = vmatprep.subr.bf16.mxu0 %v1025_v59  ;;  %957 = vmatpush3.bf16.msra.mxu1 %v1024_v60 }
  0x53   :  { %958 = vmatprep.subr.bf16.mxu1 %v1026_v61 }
  0x55   :  { %937 = vmatpush3.bf16.msra.mxu0 %v1027_v62 }
  0x56   :  { %938 = vmatprep.subr.bf16.mxu0 %v1029_v63  ;;  %959 = vmatpush3.bf16.msra.mxu1 %v1028_v0 }
  0x57   :  { %960 = vmatprep.subr.bf16.mxu1 %v1030_v1 }
  0x59   :  { %939 = vmatpush3.bf16.msra.mxu0 %v1031_v2 }
  0x5a   :  { %940 = vmatprep.subr.bf16.mxu0 %v1033_v3  ;;  %961 = vmatpush3.bf16.msra.mxu1 %v1032_v4 }
  0x5b   :  { %962 = vmatprep.subr.bf16.mxu1 %v1034_v5 }
  0x5d   :  { %941 = vmatpush3.bf16.msra.mxu0 %v1035_v6 }
  0x5e   :  { %942 = vmatprep.subr.bf16.mxu0 %v1037_v7  ;;  %963 = vmatpush3.bf16.msra.mxu1 %v1036_v8 }
  0x5f   :  { %964 = vmatprep.subr.bf16.mxu1 %v1038_v9 }
  0x61   :  { %943 = vmatpush3.bf16.msra.mxu0 %v1039_v10 }
  0x62   :  { %944 = vmatprep.subr.bf16.mxu0 %v1041_v11  ;;  %965 = vmatpush3.bf16.msra.mxu1 %v1040_v12 }
  0x63   :  { %966 = vmatprep.subr.bf16.mxu1 %v1042_v13 }
  0x65   :  { %945 = vmatpush3.bf16.msra.mxu0 %v1043_v15 }
  0x66   :  { %967 = vmatpush3.bf16.msra.mxu1 %v1044_v18 }
  0x68   :  { %728 = vmatmul.mubr.bf16.vlgmr.msra.gmra.mrb[4].mxu0 %v92_v21 }
  0x69   :  { %768 = vmatmul.mubr.bf16.vlgmr.msra.gmra.mrb[4].mxu1 %v94_v25 }
 0x11b   :  { %v902_v27 = vpop.f32.mrb[0].mxu0 }
 0x11c   :  { %v903_v29 = vpop.f32.mrb[1].mxu0  ;;  %v924_v30 = vpop.f32.mrb[0].mxu1 }
 0x11d   :  { %v904_v31 = vadd.f32 %v903_v29, %v902_v27  ;;  %v905_v32 = vpop.f32.mrb[2].mxu0  ;;  %v925_v33 = vpop.f32.mrb[1].mxu1 }
 0x11e   :  { %v906_v34 = vpop.f32.mrb[3].mxu0  ;;  %v926_v36 = vadd.f32 %v925_v33, %v924_v30  ;;  %v927_v37 = vpop.f32.mrb[2].mxu1 }
 0x11f   :  { %v650_v35 = vadd.f32 %v904_v31, %v821_v28  ;;  %v928_v38 = vpop.f32.mrb[3].mxu1 }
 0x121   :  { %v690_v39 = vadd.f32 %v926_v36, %v650_v35 }
 0x13b   :  { %v946_v40 = vpop.f32.mrb[4].mxu0 }
 0x13c   :  { %v947_v41 = vpop.f32.mrb[5].mxu0  ;;  %v968_v43 = vpop.f32.mrb[4].mxu1 }
 0x13d   :  { %v948_v44 = vadd.f32 %v947_v41, %v946_v40  ;;  %v949_v45 = vpop.f32.mrb[6].mxu0  ;;  %v969_v46 = vpop.f32.mrb[5].mxu1 }
 0x13e   :  { %v950_v47 = vpop.f32.mrb[7].mxu0  ;;  %v970_v49 = vadd.f32 %v969_v46, %v968_v43  ;;  %v971_v50 = vpop.f32.mrb[6].mxu1 }
 0x13f   :  { %v730_v48 = vadd.f32 %v948_v44, %v690_v39  ;;  %v972_v51 = vpop.f32.mrb[7].mxu1 }
 0x141   :  { %v770_v52 = vadd.f32 %v970_v49, %v730_v48 }
 0x143   :  { %v778_v53 = vsel %vm777_vm0, %v770_v52, -1e+30  ;;  %v783_v55 = vsel %vm777_vm0, -1e+30, %v770_v52 }
 0x144   :  { %v780_v54 = vsel %vm779_vm1, %v778_v53, -inf  ;;  %v784_v24 = vsel %vm779_vm1, %v783_v55, -inf }
 0x145   :  { %781 = vmax.xlane.f32.xlu0 %v780_v54 }
 0x149   :  { %785 = vmax.xlane.f32.xlu0 %v784_v24 }
 0x1d2   :  { %v782_v56 = vpop.xlane.xlu0 %781 }
 0x1d6   :  { %v786_v57 = vpop.xlane.xlu0 %785 }
 0x1d7   :  { %v787_v58 = vsel %vm777_vm0, %v782_v56, %v786_v57 }
 0x1d8   :  { %v788_v59 = vsub.f32 %v770_v52, %v787_v58 }
 0x1da   :  { %v789_v60 = vmul.f32 1.442695, %v788_v59 }
 0x1dc   :  { %1046 = vpow2.f32 %v789_v60 }
 0x1e6   :  { %v1047_v61 = vpop.eup %1046 }
 0x1e7   :  { %v791_v62 = vsel %vm777_vm0, %v1047_v61, 0.0  ;;  %v795_v0 = vsel %vm777_vm0, 0.0, %v1047_v61 }
 0x1e8   :  { %v792_v63 = vsel %vm779_vm1, %v791_v62, 0.0  ;;  %v796_v1 = vsel %vm779_vm1, %v795_v0, 0.0 }
 0x1e9   :  { %793 = vadd.xlane.f32.xlu1 %v792_v63 }
 0x1ed   :  { %797 = vadd.xlane.f32.xlu1 %v796_v1 }
 0x276   :  { %v794_v2 = vpop.xlane.xlu1 %793 }
 0x277   :  { %1048 = vrcp.f32 %v794_v2 }
 0x27a   :  { %v798_v3 = vpop.xlane.xlu1 %797 }
 0x27b   :  { %1050 = vrcp.f32 %v798_v3 }
 0x281   :  { %v1049_v4 = vpop.eup %1048 }
 0x285   :  { %v1051_v5 = vpop.eup %1050 }
 0x286   :  { %v801_v6 = vsel %vm777_vm0, %v1049_v4, %v1051_v5 }
 0x287   :  { %v802_v7 = vmul.f32 0.5, %v801_v6 }
 0x289   :  { %v803_v8 = vmul.f32 %v1047_v61, %v802_v7 }
 0x28b   :  { %804 = vst [vmem:[#allocation7] sm:$0x3] %v803_v8 }
 0x28c   :  { %1107 = shalt.err (!%p1104_p6)
}
 0x28d   :  { %s1108_s15 = scalar_lea.hbm %s1217_s3, 32 }
 0x28e   :  { %p1109_p7 = scmp.ne.s32.totalorder %s1217_s3, %s1108_s15  ;;  %p1112_p8 = scmp.lt.u32.totalorder %s1108_s15, %s1217_s3 }
 0x290   :  { %p1114_p9 = pnand %p1112_p8, %p1109_p7 }
 0x292   :  { %1117 = shalt.err (!%p1114_p9)
}
 0x293   :  { %814 = dma.vmem_to_hbm [thread:$0]  %s812_s11, 32, %s1217_s3, [#allocation4]  }
 0x294   :  { %1122 = dma.done.wait [#allocation4], 32  }
 0x295   :  { %1123 = vsyncadd [#allocation4], 4294967264 }
 0x296   :  { %818 = vsyncpa [#allocation3], 1 }
 0x297   :  { %819 = vsyncpa [#allocation6], 1 }
 0x298   :  { %820 = vsyncpa [#allocation4], 1 }

</bundles_post_ra>
